<compile_context>
chip_gen: v7x
topology: tpu7x:2x2x1
jax: 0.10.0
libtpu: 0.0.40
codegen_flags: <defaults>
</compile_context>

<pallas_src>
import functools

import jax
import jax.numpy as jnp
from jax import lax
from jax.experimental import pallas as pl
from jax.experimental.pallas import tpu as pltpu


# ----------------------------- Pallas kernel -------------------------------

def _edgev_loss_kernel(x1_ref, x2_ref, o_ref, acc1_ref, acc2_ref,
                       *, shift, valid_lanes):
    """One grid step over a (rows_tile, H*W) block of each input.

    x1_ref / x2_ref : (rows_tile, H*W) native-dtype VMEM tiles.
    o_ref           : (1, 1) f32 output (written on the last step only).
    acc1_ref/acc2_ref: (rows_tile, H*W) f32 VMEM accumulators (scratch,
                       persistent across grid steps).
    """
    step = pl.program_id(0)

    @pl.when(step == 0)
    def _():
        acc1_ref[...] = jnp.zeros_like(acc1_ref)
        acc2_ref[...] = jnp.zeros_like(acc2_ref)

    # Load native-dtype tiles, upcast in-register (saves HBM bytes vs. a
    # wrapper-side cast for bf16/fp16 inputs).
    x1 = x1_ref[...].astype(jnp.float32)
    x2 = x2_ref[...].astype(jnp.float32)

    # Each sublane row is one flattened (H, W) image plane; the pixel below
    # flattened index f = h*W + w sits at lane f + W.  A full-vreg XLU rotation
    # by (H*W - W) puts lane (f + W) mod H*W at lane f — identical pairing to
    # the PyTorch [:, :, 1:, :] / [:, :, :-1, :] slices for f < (H-1)*W.
    x1_dn = pltpu.roll(x1, shift=shift, axis=1)
    x2_dn = pltpu.roll(x2, shift=shift, axis=1)

    # Lanes >= (H-1)*W wrapped around to the first image row -> mask them out.
    lane = lax.broadcasted_iota(jnp.int32, x1.shape, 1)
    keep = lane < valid_lanes

    # Hot loop stays on the VPU: elementwise |diff|, select, add.  The XLU
    # cross-lane reduce is deferred to the final step.
    acc1_ref[...] += jnp.where(keep, jnp.abs(x1_dn - x1), 0.0)
    acc2_ref[...] += jnp.where(keep, jnp.abs(x2_dn - x2), 0.0)

    @pl.when(step == pl.num_programs(0) - 1)
    def _():
        # PyTorch does int(sum); the sums are non-negative, so trunc == floor.
        s1 = jnp.floor(jnp.sum(acc1_ref[...], keepdims=True))   # (1, 1)
        s2 = jnp.floor(jnp.sum(acc2_ref[...], keepdims=True))
        # TODO(synk): PyTorch raises ZeroDivisionError if int(s2)==0; here the
        # division yields inf/nan instead.
        o_ref[...] = -jnp.log(s1 / s2)


# ------------------------------- Wrapper ------------------------------------

def edgev_loss(x1, x2, *, vmem_budget_bytes=4 * 1024 * 1024):
    """x1, x2: (N, C, H, W) arrays (any float dtype) -> scalar f32 loss."""
    assert x1.shape == x2.shape
    assert x1.dtype == x2.dtype
    N, C, H, W = x1.shape
    assert H >= 2

    rows = N * C
    HW = H * W

    # Contiguous (free) reshape: image planes on sublanes, H*W on lanes.
    # Native dtype is preserved; the kernel upcasts on load.
    x1f = x1.reshape(rows, HW)
    x2f = x2.reshape(rows, HW)

    # ---- Pick the row tile from a conservative VMEM budget ------------------
    # Per block row: 2 inputs x 2 pipeline buffers (native dtype)
    #              + 2 f32 accumulators.
    in_itemsize = x1.dtype.itemsize
    bytes_per_row = HW * (2 * 2 * in_itemsize + 2 * 4)
    max_rows = max(8, (vmem_budget_bytes // bytes_per_row) // 8 * 8)
    if rows <= max_rows or rows % 8 != 0:
        rows_tile = rows                     # single block covers all rows
    else:
        rows_tile = max_rows
        while rows % rows_tile != 0:         # need an exact sublane tiling
            rows_tile -= 8
    grid = (rows // rows_tile,)

    kern = functools.partial(
        _edgev_loss_kernel, shift=HW - W, valid_lanes=(H - 1) * W)

    out = pl.pallas_call(
        kern,
        out_shape=jax.ShapeDtypeStruct((1, 1), jnp.float32),
        grid=grid,
        in_specs=[
            pl.BlockSpec((rows_tile, HW), lambda i: (i, 0)),
            pl.BlockSpec((rows_tile, HW), lambda i: (i, 0)),
        ],
        out_specs=pl.BlockSpec((1, 1), lambda i: (0, 0)),
        scratch_shapes=[
            pltpu.VMEM((rows_tile, HW), jnp.float32),
            pltpu.VMEM((rows_tile, HW), jnp.float32),
        ],
        compiler_params=pltpu.CompilerParams(
            # The single grid axis carries the running-sum accumulators, so it
            # must stay "arbitrary" (sequential).
            dimension_semantics=("arbitrary",)),
    )(x1f, x2f)
    return out[0, 0]


# ------------------------------ Reference ------------------------------------

def edgev_loss_ref(x1, x2):
    x1 = x1.astype(jnp.float32)
    x2 = x2.astype(jnp.float32)
    s1 = jnp.sum(jnp.abs(x1[:, :, :-1, :] - x1[:, :, 1:, :]))
    s2 = jnp.sum(jnp.abs(x2[:, :, :-1, :] - x2[:, :, 1:, :]))
    return -jnp.log(jnp.floor(s1) / jnp.floor(s2))


# -------------------------------- Main ---------------------------------------

if __name__ == "__main__":
    N, C, H, W = 2, 4, 16, 16          # NCHW, as the PyTorch module expects
    key = jax.random.PRNGKey(0)
    k1, k2 = jax.random.split(key)
    X1 = jax.random.normal(k1, (N, C, H, W), jnp.float32)
    X2 = jax.random.normal(k2, (N, C, H, W), jnp.float32) * 1.5 + 0.1

    loss = jax.jit(edgev_loss)(X1, X2)
    loss = jax.block_until_ready(loss)

    ref = edgev_loss_ref(X1, X2)
    assert bool(jnp.isfinite(loss)), float(loss)
    assert jnp.allclose(loss, ref, atol=1e-3, rtol=1e-4), (float(loss), float(ref))

    print("KERNEL_OK")
</pallas_src>

<mosaic_0001>
module attributes {stable_mosaic.version = 11 : i64} {
  func.func @_edgev_loss_kernel(%arg0: i32, %arg1: memref<8x256xf32, #tpu.memory_space<vmem>>, %arg2: memref<8x256xf32, #tpu.memory_space<vmem>>, %arg3: memref<1x1xf32, #tpu.memory_space<vmem>>, %arg4: memref<8x256xf32, #tpu.memory_space<vmem>>, %arg5: memref<8x256xf32, #tpu.memory_space<vmem>>) attributes {dimension_semantics = [#tpu.dimension_semantics<arbitrary>], iteration_bounds = array<i64: 1>, scalar_prefetch = 0 : i64, scratch_operands = 2 : i64, tpu.core_type = #tpu.core_type<tc>, window_params = [{transform_indices = @transform_0, window_bounds = array<i64: 8, 256>}, {transform_indices = @transform_1, window_bounds = array<i64: 8, 256>}, {pipeline_mode = #tpu.pipeline_mode<synchronous>, transform_indices = @transform_2, window_bounds = array<i64: 1, 1>}]} {
    %c0_i32 = arith.constant 0 : i32
    %0 = arith.cmpi eq, %arg0, %c0_i32 : i32
    %1 = arith.extui %0 : i1 to i32
    %c0_i32_0 = arith.constant 0 : i32
    %2 = arith.cmpi ne, %1, %c0_i32_0 : i32
    scf.if %2 {
      %cst_17 = arith.constant 0.000000e+00 : f32
      %27 = vector.broadcast %cst_17 : f32 to vector<8x256xf32>
      %c0_18 = arith.constant 0 : index
      %c0_19 = arith.constant 0 : index
      %28 = vector.load %arg4[%c0_18, %c0_19] : memref<8x256xf32, #tpu.memory_space<vmem>>, vector<8x256xf32>
      tpu.vector_store %arg4[%c0_18, %c0_19], %27 {strides = array<i32>} : memref<8x256xf32, #tpu.memory_space<vmem>>, vector<8x256xf32>,
      %cst_20 = arith.constant 0.000000e+00 : f32
      %29 = vector.broadcast %cst_20 : f32 to vector<8x256xf32>
      %c0_21 = arith.constant 0 : index
      %c0_22 = arith.constant 0 : index
      %30 = vector.load %arg5[%c0_21, %c0_22] : memref<8x256xf32, #tpu.memory_space<vmem>>, vector<8x256xf32>
      tpu.vector_store %arg5[%c0_21, %c0_22], %29 {strides = array<i32>} : memref<8x256xf32, #tpu.memory_space<vmem>>, vector<8x256xf32>,
    } else {
    }
    %c0 = arith.constant 0 : index
    %c0_1 = arith.constant 0 : index
    %3 = vector.load %arg1[%c0, %c0_1] : memref<8x256xf32, #tpu.memory_space<vmem>>, vector<8x256xf32>
    %c0_2 = arith.constant 0 : index
    %c0_3 = arith.constant 0 : index
    %4 = vector.load %arg2[%c0_2, %c0_3] : memref<8x256xf32, #tpu.memory_space<vmem>>, vector<8x256xf32>
    %c240_i32 = arith.constant 240 : i32
    %5 = tpu.dynamic_rotate %3 by %c240_i32 dim 1 : vector<8x256xf32>, i32 -> vector<8x256xf32>
    %c240_i32_4 = arith.constant 240 : i32
    %6 = tpu.dynamic_rotate %4 by %c240_i32_4 dim 1 : vector<8x256xf32>, i32 -> vector<8x256xf32>
    %7 = tpu.iota {dimensions = array<i32: 1>} : vector<8x256xi32>
    %c240_i32_5 = arith.constant 240 : i32
    %8 = vector.broadcast %c240_i32_5 : i32 to vector<8x256xi32>
    %9 = arith.cmpi slt, %7, %8 : vector<8x256xi32>
    %c0_6 = arith.constant 0 : index
    %c0_7 = arith.constant 0 : index
    %10 = vector.load %arg4[%c0_6, %c0_7] : memref<8x256xf32, #tpu.memory_space<vmem>>, vector<8x256xf32>
    %11 = arith.subf %5, %3 : vector<8x256xf32>
    %12 = math.absf %11 : vector<8x256xf32>
    %cst = arith.constant 0.000000e+00 : f32
    %13 = vector.broadcast %cst : f32 to vector<8x256xf32>
    %14 = arith.select %9, %12, %13 : vector<8x256xi1>, vector<8x256xf32>
    %15 = arith.addf %10, %14 : vector<8x256xf32>
    %c0_8 = arith.constant 0 : index
    %c0_9 = arith.constant 0 : index
    %16 = vector.load %arg4[%c0_8, %c0_9] : memref<8x256xf32, #tpu.memory_space<vmem>>, vector<8x256xf32>
    tpu.vector_store %arg4[%c0_8, %c0_9], %15 {strides = array<i32>} : memref<8x256xf32, #tpu.memory_space<vmem>>, vector<8x256xf32>,
    %c0_10 = arith.constant 0 : index
    %c0_11 = arith.constant 0 : index
    %17 = vector.load %arg5[%c0_10, %c0_11] : memref<8x256xf32, #tpu.memory_space<vmem>>, vector<8x256xf32>
    %18 = arith.subf %6, %4 : vector<8x256xf32>
    %19 = math.absf %18 : vector<8x256xf32>
    %cst_12 = arith.constant 0.000000e+00 : f32
    %20 = vector.broadcast %cst_12 : f32 to vector<8x256xf32>
    %21 = arith.select %9, %19, %20 : vector<8x256xi1>, vector<8x256xf32>
    %22 = arith.addf %17, %21 : vector<8x256xf32>
    %c0_13 = arith.constant 0 : index
    %c0_14 = arith.constant 0 : index
    %23 = vector.load %arg5[%c0_13, %c0_14] : memref<8x256xf32, #tpu.memory_space<vmem>>, vector<8x256xf32>
    tpu.vector_store %arg5[%c0_13, %c0_14], %22 {strides = array<i32>} : memref<8x256xf32, #tpu.memory_space<vmem>>, vector<8x256xf32>,
    %c0_i32_15 = arith.constant 0 : i32
    %24 = arith.cmpi eq, %arg0, %c0_i32_15 : i32
    %25 = arith.extui %24 : i1 to i32
    %c0_i32_16 = arith.constant 0 : i32
    %26 = arith.cmpi ne, %25, %c0_i32_16 : i32
    scf.if %26 {
      %c0_17 = arith.constant 0 : index
      %c0_18 = arith.constant 0 : index
      %27 = vector.load %arg4[%c0_17, %c0_18] : memref<8x256xf32, #tpu.memory_space<vmem>>, vector<8x256xf32>
      %28 = vector.shape_cast %27 : vector<8x256xf32> to vector<1x8x256xf32>
      %cst_19 = arith.constant dense<0.000000e+00> : vector<1xf32>
      %29 = vector.multi_reduction <add>, %28, %cst_19 [1, 2] : vector<1x8x256xf32> to vector<1xf32>
      %30 = vector.shape_cast %29 : vector<1xf32> to vector<1x1x1xf32>
      %31 = vector.extract %30[0, 0, 0] : f32 from vector<1x1x1xf32>
      %32 = vector.broadcast %31 : f32 to vector<1x1xf32>
      %33 = math.floor %32 : vector<1x1xf32>
      %c0_20 = arith.constant 0 : index
      %c0_21 = arith.constant 0 : index
      %34 = vector.load %arg5[%c0_20, %c0_21] : memref<8x256xf32, #tpu.memory_space<vmem>>, vector<8x256xf32>
      %35 = vector.shape_cast %34 : vector<8x256xf32> to vector<1x8x256xf32>
      %cst_22 = arith.constant dense<0.000000e+00> : vector<1xf32>
      %36 = vector.multi_reduction <add>, %35, %cst_22 [1, 2] : vector<1x8x256xf32> to vector<1xf32>
      %37 = vector.shape_cast %36 : vector<1xf32> to vector<1x1x1xf32>
      %38 = vector.extract %37[0, 0, 0] : f32 from vector<1x1x1xf32>
      %39 = vector.broadcast %38 : f32 to vector<1x1xf32>
      %40 = math.floor %39 : vector<1x1xf32>
      %41 = arith.divf %33, %40 : vector<1x1xf32>
      %42 = math.log %41 : vector<1x1xf32>
      %cst_23 = arith.constant 0.000000e+00 : f32
      %43 = vector.broadcast %cst_23 : f32 to vector<1x1xf32>
      %44 = arith.subf %43, %42 : vector<1x1xf32>
      %c0_24 = arith.constant 0 : index
      %c0_25 = arith.constant 0 : index
      %45 = vector.load %arg3[%c0_24, %c0_25] : memref<1x1xf32, #tpu.memory_space<vmem>>, vector<1x1xf32>
      tpu.vector_store %arg3[%c0_24, %c0_25], %44 {strides = array<i32>} : memref<1x1xf32, #tpu.memory_space<vmem>>, vector<1x1xf32>,
    } else {
    }
    return
  }
  func.func @transform_0(%arg0: i32) -> (i32, i32) {
    %c0_i32 = arith.constant 0 : i32
    %c0_i32_0 = arith.constant 0 : i32
    return %arg0, %c0_i32 : i32, i32
  }
  func.func @transform_1(%arg0: i32) -> (i32, i32) {
    %c0_i32 = arith.constant 0 : i32
    %c0_i32_0 = arith.constant 0 : i32
    return %arg0, %c0_i32 : i32, i32
  }
  func.func @transform_2(%arg0: i32) -> (i32, i32) {
    %c0_i32 = arith.constant 0 : i32
    %c0_i32_0 = arith.constant 0 : i32
    %c0_i32_1 = arith.constant 0 : i32
    return %c0_i32, %c0_i32_0 : i32, i32
  }
}

</mosaic_0001>

<bundles_post_ra>
// kernel: edgev_loss.1
= control target key start
LH: loop header
LB: loop body
LE: loop exit
PB: predicated region body
PF: predicated region fallthrough
CT: control target
= control target key end

     0   :  { %s152_s13 = smov 112   ;;  %s193_s0 = inlined_call_operand.vmem [shape: f32[8,256], index: 0, kind: input, shape index: {}]   ;;  %s194_s1 = inlined_call_operand.vmem [shape: f32[8,256], index: 1, kind: input, shape index: {}]   ;;  %s195_s2 = inlined_call_operand.hbm [shape: f32[1,1], index: 2, kind: output, shape index: {}]  }
   0x1   :  { %v22_v0 = vld [vmem:[%s194_s1] sm:$0xff] }
   0x2   :  { %v20_v1 = vld [vmem:[%s193_s0] sm:$0xff]  ;;  %33 = vrot.lane.b32.xlu1 %v22_v0, %s152_s13 }
   0x3   :  { %24 = vrot.lane.b32.xlu0 %v20_v1, %s152_s13 }
   0x4   :  { %7 = vsyncpa [#allocation5], 0  ;;  %v23_v2 = vld [vmem:[%s194_s1 + $0x8] sm:$0xff]  ;;  %v28_v4 = vlaneseq  ;;  %s153_s18 = smov [#allocation4]   ;;  %vm102_vm2 = vcmask 0  }
   0x5   :  { %v21_v3 = vld [vmem:[%s193_s0 + $0x8] sm:$0xff]  ;;  %s110_s19 = sshll.u32 %s153_s18, 4  ;;  %s111_s19 = int_to_ptr.vmem [resolvable:$true] %s110_s19 }
   0x6   :  { %35 = vrot.lane.b32.xlu1 %v23_v2, %s152_s13  ;;  %v29_v5 = vand.u32 127, %v28_v4  ;;  %s128_s20 = scalar_lea.vmem %s111_s19, 16  ;;  %s132_s21 = scalar_lea.vmem %s111_s19, 32 }
   0x7   :  { %26 = vrot.lane.b32.xlu0 %v21_v3, %s152_s13  ;;  %p129_p0 = scmp.ne.s32.totalorder %s111_s19, %s128_s20  ;;  %p133_p1 = scmp.lt.s32.totalorder %s111_s19, %s111_s19 }
   0x8   :  { %vm30_vm0 = vcmp.lt.s32.totalorder %v29_v5, 112  ;;  %v39_v8 = vadd.s32 128, %v29_v5  ;;  %p134_p2 = scmp.lt.s32.totalorder %s132_s21, %s128_s20 }
   0xa   :  { %vm41_vm1 = vcmp.lt.s32.totalorder %v39_v8, 240  ;;  %p135_p3 = por %p134_p2, %p133_p1 }
   0xc   :  { %p136_p4 = pnand %p135_p3, %p129_p0 }
  0x74   :  { %v34_v6 = vpop.permute.xlu1 %33 }
  0x75   :  { %v25_v7 = vpop.permute.xlu0 %24 }
  0x78   :  { %v36_v9 = vpop.permute.xlu1 %35 }
  0x79   :  { %v27_v10 = vpop.permute.xlu0 %26  ;;  %v37_v11 = vsel %vm30_vm0, %v34_v6, %v36_v9  ;;  %v38_v12 = vsel %vm30_vm0, %v36_v9, %v34_v6 }
  0x7a   :  { %v31_v13 = vsel %vm30_vm0, %v25_v7, %v27_v10  ;;  %v32_v14 = vsel %vm30_vm0, %v27_v10, %v25_v7  ;;  %v56_v15 = vsub.f32 %v37_v11, %v22_v0  ;;  %v57_v16 = vsub.f32 %v38_v12, %v23_v2 }
  0x7b   :  { %v44_v17 = vsub.f32 %v31_v13, %v20_v1  ;;  %v45_v18 = vsub.f32 %v32_v14, %v21_v3 }
  0x7c   :  { %v58_v19 = vand.u32 2147483647, %v56_v15  ;;  %v59_v20 = vand.u32 2147483647, %v57_v16 }
  0x7d   :  { %v46_v21 = vand.u32 2147483647, %v44_v17  ;;  %v47_v22 = vand.u32 2147483647, %v45_v18 }
  0x7e   :  { %v61_v23 = vsel %vm41_vm1, %v59_v20, 0.0 }
  0x7f   :  { %v85_v24 = vadd.f32 %v61_v23, %v58_v19  ;;  %v49_v25 = vsel %vm41_vm1, %v47_v22, 0.0 }
  0x80   :  { %v71_v26 = vadd.f32 %v49_v25, %v46_v21 }
  0x81   :  { %86 = vadd.xlane.f32.xlu1 %v85_v24 }
  0x82   :  { %72 = vadd.xlane.f32.xlu0 %v71_v26 }
 0x10e   :  { %v87_v27 = vpop.xlane.xlu1 %86 }
 0x10f   :  { %v88_v28 = vrot.slane %v87_v27, 4  ;;  %v73_v29 = vpop.xlane.xlu0 %72 }
 0x110   :  { %v74_v30 = vrot.slane %v73_v29, 4 }
 0x111   :  { %v89_v31 = vadd.f32 %v88_v28, %v87_v27 }
 0x112   :  { %v75_v32 = vadd.f32 %v74_v30, %v73_v29 }
 0x113   :  { %v90_v33 = vrot.slane %v89_v31, 2 }
 0x114   :  { %v76_v34 = vrot.slane %v75_v32, 2 }
 0x115   :  { %v91_v35 = vadd.f32 %v90_v33, %v89_v31 }
 0x116   :  { %v77_v36 = vadd.f32 %v76_v34, %v75_v32 }
 0x117   :  { %v92_v37 = vrot.slane %v91_v35, 1 }
 0x118   :  { %v78_v38 = vrot.slane %v77_v36, 1 }
 0x119   :  { %v93_v39 = vadd.f32 %v92_v37, %v91_v35 }
 0x11a   :  { %v79_v40 = vadd.f32 %v78_v38, %v77_v36 }
 0x11c   :  { %118 = vpush %v79_v40 }
 0x11d   :  { %120 = vpush %v93_v39 }
 0x14d   :  { %s119_s0 = spop %118 }
 0x14e   :  { %s121_s1 = spop %120  ;;  %v81_v43 = vstv %s119_s0 }
 0x14f   :  { %v95_v41 = vstv %s121_s1  ;;  %v82_v44 = vfloor.f32 %v81_v43 }
 0x150   :  { %v96_v42 = vfloor.f32 %v95_v41 }
 0x152   :  { %124 = vrcp.f32 %v96_v42 }
 0x15c   :  { %v125_v45 = vpop.eup %124 }
 0x15d   :  { %v98_v46 = vmul.f32 %v125_v45, %v82_v44 }
 0x15f   :  { %126 = vlog2.f32 %v98_v46 }
 0x169   :  { %v127_v47 = vpop.eup %126 }
 0x16a   :  { %v100_v48 = vmul.f32 0.6931472, %v127_v47 }
 0x16c   :  { %v101_v49 = vsub.f32 0.0, %v100_v48 }
 0x16e   :  { %103 = vst.msk [vmem:[#allocation4] sm:$0x1] %vm102_vm2, %v101_v49 }
 0x16f   :  { %139 = shalt.err (!%p136_p4)
}
 0x170   :  { %s140_s24 = scalar_lea.hbm %s195_s2, 16 }
 0x171   :  { %p141_p5 = scmp.ne.s32.totalorder %s195_s2, %s140_s24  ;;  %p144_p6 = scmp.lt.u32.totalorder %s140_s24, %s195_s2 }
 0x173   :  { %p146_p7 = pnand %p144_p6, %p141_p5 }
 0x175   :  { %149 = shalt.err (!%p146_p7)
}
 0x176   :  { %113 = dma.vmem_to_hbm [thread:$0]  %s111_s19, 16, %s195_s2, [#allocation5]  }
 0x177   :  { %150 = dma.done.wait [#allocation5], 16  }
 0x178   :  { %151 = vsyncadd [#allocation5], 4294967280 }
 0x179   :  { %117 = vsyncpa [#allocation5], 1 }

</bundles_post_ra>
